<compile_context>
chip_gen: v5e
topology: v5e:2x2
jax: 0.10.0
libtpu: 0.0.40
codegen_flags: <defaults>
</compile_context>

<pallas_src>
import functools

import jax
import jax.numpy as jnp
from jax.experimental import pallas as pl
from jax.experimental.pallas import tpu as pltpu

_LANE = 128
_SUBLANE = 8
_MAX_BLOCK_ROWS = 8192                  # 8192 x 128 x 4B = 4 MiB per f32 input tile
_VMEM_LIMIT_BYTES = 32 * 1024 * 1024    # raises v5e's 16 MiB scoped default; safe on v6e/v7x


def _round_up(x, m):
    return (x + m - 1) // m * m


def _static_pow(x, gamma):
    """x ** gamma with gamma static. Integer gamma -> exponentiation by
    squaring (VPU multiplies only, no EUP exp/log)."""
    g = float(gamma)
    if g == int(g) and 0 <= int(g) <= 32:
        n = int(g)
        if n == 0:
            return jnp.ones_like(x)
        result = None
        base = x
        while n:
            if n & 1:
                result = base if result is None else result * base
            n >>= 1
            if n:
                base = base * base
        return result
    return x ** g


def _focal_kernel(x_ref, t_ref, o_ref, acc_ref, *, gamma, scale,
                  block_rows, rows_valid, hard_targets):
    step = pl.program_id(0)
    last = pl.num_programs(0) - 1

    @pl.when(step == 0)
    def _init():
        acc_ref[...] = jnp.zeros_like(acc_ref)

    p = x_ref[...].astype(jnp.float32)
    t = t_ref[...].astype(jnp.float32)

    if hard_targets:
        # Exact (in f32) for t in {0,1}: one log per element, no exp.
        pt = jnp.where(t > 0.5, p, 1.0 - p)
        bce = -jnp.maximum(jnp.log(pt), -100.0)
    else:
        # F.binary_cross_entropy(reduction='none'); PyTorch clamps log terms at -100.
        log_p = jnp.maximum(jnp.log(p), -100.0)
        log_1mp = jnp.maximum(jnp.log(1.0 - p), -100.0)
        bce = -(t * log_p + (1.0 - t) * log_1mp)
        pt = jnp.exp(-bce)

    # alpha and 1/total are folded into `scale` applied once in the epilogue.
    loss = _static_pow(1.0 - pt, gamma) * bce

    n_groups = block_rows // _SUBLANE

    def _accumulate(v):
        # (block_rows,128) -> (groups,8,128) is layout-free (splits the sublane
        # axis on native tile boundaries); the axis-0 sum is pure VPU vreg adds
        # into the tiny (8,128) accumulator.
        acc_ref[...] += v.reshape(n_groups, _SUBLANE, _LANE).sum(axis=0)

    needs_mask = (rows_valid % block_rows) != 0
    if needs_mask:
        # Only the final (partial) block overhangs the array; mask it there so
        # every other step stays mask-free.
        @pl.when(step != last)
        def _full():
            _accumulate(loss)

        @pl.when(step == last)
        def _tail():
            row = jax.lax.broadcasted_iota(jnp.int32, (block_rows, _LANE), 0)
            valid = (step * block_rows + row) < rows_valid
            _accumulate(jnp.where(valid, loss, 0.0))
    else:
        _accumulate(loss)

    @pl.when(step == last)
    def _finalize():
        # Single cross-lane reduce of the (8,128) accumulator, then scale.
        o_ref[...] = jnp.full(o_ref.shape, jnp.sum(acc_ref[...]) * scale,
                              dtype=o_ref.dtype)


def binary_focal_loss(inputs, targets, alpha=0.5, gamma=4.0,
                      hard_targets=False, max_block_rows=_MAX_BLOCK_ROWS):
    """Mean binary focal loss (logits=False, reduce=True)."""
    total = int(inputs.size)
    assert int(targets.size) == total and total > 0

    def _as_rows(a):
        flat = a.reshape(-1)            # free view for contiguous arrays
        if total % _LANE:
            # TODO(synk): a sub-128 remainder still needs this (whole-array)
            # pad to reach a lane-dense [rows,128] view; pad value 1.0 gives
            # exactly zero loss contribution (logs are clamped at -100).
            flat = jnp.pad(flat, (0, _round_up(total, _LANE) - total),
                           constant_values=1.0)
        return flat.reshape(-1, _LANE)

    x = _as_rows(inputs)
    t = _as_rows(targets)
    rows = x.shape[0]

    block_rows = min(max_block_rows, _round_up(rows, _SUBLANE))
    n_tiles = pl.cdiv(rows, block_rows)

    kernel = functools.partial(
        _focal_kernel,
        gamma=float(gamma),
        scale=float(alpha) / float(total),   # fold alpha + mean divisor
        block_rows=block_rows,
        rows_valid=rows,
        hard_targets=bool(hard_targets),
    )

    out = pl.pallas_call(
        kernel,
        out_shape=jax.ShapeDtypeStruct((_SUBLANE, _LANE), jnp.float32),
        grid_spec=pltpu.PrefetchScalarGridSpec(
            num_scalar_prefetch=0,
            grid=(n_tiles,),
            in_specs=[
                pl.BlockSpec((block_rows, _LANE), lambda i: (i, 0)),
                pl.BlockSpec((block_rows, _LANE), lambda i: (i, 0)),
            ],
            out_specs=pl.BlockSpec((_SUBLANE, _LANE), lambda i: (0, 0)),
            scratch_shapes=[pltpu.VMEM((_SUBLANE, _LANE), jnp.float32)],
        ),
        compiler_params=pltpu.CompilerParams(
            dimension_semantics=("arbitrary",),
            vmem_limit_bytes=_VMEM_LIMIT_BYTES),
    )(x, t)

    return out[0, 0]


def _reference(inputs, targets, alpha=0.5, gamma=4.0):
    p = inputs.astype(jnp.float32)
    t = targets.astype(jnp.float32)
    bce = -(t * jnp.maximum(jnp.log(p), -100.0)
            + (1.0 - t) * jnp.maximum(jnp.log(1.0 - p), -100.0))
    pt = jnp.exp(-bce)
    return jnp.mean(alpha * (1.0 - pt) ** gamma * bce)


def _run_case(key, shape, dtype=jnp.float32, hard_targets=False,
              max_block_rows=_MAX_BLOCK_ROWS):
    k1, k2 = jax.random.split(key)
    inputs = jax.random.uniform(k1, shape, dtype=jnp.float32,
                                minval=1e-4, maxval=1.0 - 1e-4).astype(dtype)
    targets = (jax.random.uniform(k2, shape) > 0.5).astype(dtype)
    loss = jax.block_until_ready(
        binary_focal_loss(inputs, targets, hard_targets=hard_targets,
                          max_block_rows=max_block_rows))
    ref = _reference(inputs, targets)
    assert jnp.allclose(loss, ref, rtol=1e-5, atol=1e-6), (
        shape, dtype, hard_targets, loss, ref)


if __name__ == "__main__":
    key = jax.random.PRNGKey(0)
    k1, k2, k3, k4, k5 = jax.random.split(key, 5)

    # Primary small NCHW example (exactly tiled, single block, general path).
    _run_case(k1, (2, 4, 16, 16))

    # Multi-block accumulation + masked partial last block, no wrapper pad
    # (small max_block_rows forces the multi-tile path at a modest size).
    _run_case(k2, (4, 4, 224, 240), max_block_rows=512)

    # Hard-target fast path (1 transcendental / element).
    _run_case(k3, (2, 4, 16, 16), hard_targets=True)

    # Native bf16 inputs/targets (halves HBM traffic; cast to f32 in-kernel).
    _run_case(k4, (2, 4, 16, 16), dtype=jnp.bfloat16, hard_targets=True)

    # Total not divisible by 128 -> exercises the lane-pad fallback + row mask.
    _run_case(k5, (3, 5, 7, 11))

    print("KERNEL_OK")
</pallas_src>

<mosaic_0001>
module attributes {stable_mosaic.version = 11 : i64} {
  func.func @_focal_kernel(%arg0: i32, %arg1: memref<16x128xf32, #tpu.memory_space<vmem>>, %arg2: memref<16x128xf32, #tpu.memory_space<vmem>>, %arg3: memref<8x128xf32, #tpu.memory_space<vmem>>, %arg4: memref<8x128xf32, #tpu.memory_space<vmem>>) attributes {dimension_semantics = [#tpu.dimension_semantics<arbitrary>], iteration_bounds = array<i64: 1>, scalar_prefetch = 0 : i64, scratch_operands = 1 : i64, tpu.core_type = #tpu.core_type<tc>, window_params = [{transform_indices = @transform_0, window_bounds = array<i64: 16, 128>}, {transform_indices = @transform_1, window_bounds = array<i64: 16, 128>}, {pipeline_mode = #tpu.pipeline_mode<synchronous>, transform_indices = @transform_2, window_bounds = array<i64: 8, 128>}]} {
    %c0_i32 = arith.constant 0 : i32
    %0 = arith.cmpi eq, %arg0, %c0_i32 : i32
    %1 = arith.extui %0 : i1 to i32
    %c0_i32_0 = arith.constant 0 : i32
    %2 = arith.cmpi ne, %1, %c0_i32_0 : i32
    scf.if %2 {
      %cst_17 = arith.constant 0.000000e+00 : f32
      %36 = vector.broadcast %cst_17 : f32 to vector<8x128xf32>
      %c0_18 = arith.constant 0 : index
      %c0_19 = arith.constant 0 : index
      %37 = vector.load %arg4[%c0_18, %c0_19] : memref<8x128xf32, #tpu.memory_space<vmem>>, vector<8x128xf32>
      tpu.vector_store %arg4[%c0_18, %c0_19], %36 {strides = array<i32>} : memref<8x128xf32, #tpu.memory_space<vmem>>, vector<8x128xf32>,
    } else {
    }
    %c0 = arith.constant 0 : index
    %c0_1 = arith.constant 0 : index
    %3 = vector.load %arg1[%c0, %c0_1] : memref<16x128xf32, #tpu.memory_space<vmem>>, vector<16x128xf32>
    %c0_2 = arith.constant 0 : index
    %c0_3 = arith.constant 0 : index
    %4 = vector.load %arg2[%c0_2, %c0_3] : memref<16x128xf32, #tpu.memory_space<vmem>>, vector<16x128xf32>
    %5 = math.log %3 : vector<16x128xf32>
    %cst = arith.constant -1.000000e+02 : f32
    %6 = vector.broadcast %cst : f32 to vector<16x128xf32>
    %7 = arith.maximumf %5, %6 : vector<16x128xf32>
    %cst_4 = arith.constant 1.000000e+00 : f32
    %8 = vector.broadcast %cst_4 : f32 to vector<16x128xf32>
    %9 = arith.subf %8, %3 : vector<16x128xf32>
    %10 = math.log %9 : vector<16x128xf32>
    %cst_5 = arith.constant -1.000000e+02 : f32
    %11 = vector.broadcast %cst_5 : f32 to vector<16x128xf32>
    %12 = arith.maximumf %10, %11 : vector<16x128xf32>
    %13 = arith.mulf %4, %7 : vector<16x128xf32>
    %cst_6 = arith.constant 1.000000e+00 : f32
    %14 = vector.broadcast %cst_6 : f32 to vector<16x128xf32>
    %15 = arith.subf %14, %4 : vector<16x128xf32>
    %16 = arith.mulf %15, %12 : vector<16x128xf32>
    %17 = arith.addf %13, %16 : vector<16x128xf32>
    %cst_7 = arith.constant 0.000000e+00 : f32
    %18 = vector.broadcast %cst_7 : f32 to vector<16x128xf32>
    %19 = arith.subf %18, %17 : vector<16x128xf32>
    %cst_8 = arith.constant 0.000000e+00 : f32
    %20 = vector.broadcast %cst_8 : f32 to vector<16x128xf32>
    %21 = arith.subf %20, %19 : vector<16x128xf32>
    %22 = math.exp %21 : vector<16x128xf32>
    %cst_9 = arith.constant 1.000000e+00 : f32
    %23 = vector.broadcast %cst_9 : f32 to vector<16x128xf32>
    %24 = arith.subf %23, %22 : vector<16x128xf32>
    %25 = arith.mulf %24, %24 : vector<16x128xf32>
    %26 = arith.mulf %25, %25 : vector<16x128xf32>
    %27 = arith.mulf %26, %19 : vector<16x128xf32>
    %c0_10 = arith.constant 0 : index
    %c0_11 = arith.constant 0 : index
    %28 = vector.load %arg4[%c0_10, %c0_11] : memref<8x128xf32, #tpu.memory_space<vmem>>, vector<8x128xf32>
    %29 = vector.shape_cast %27 : vector<16x128xf32> to vector<2x8x128xf32>
    %cst_12 = arith.constant dense<0.000000e+00> : vector<8x128xf32>
    %30 = vector.multi_reduction <add>, %29, %cst_12 [0] : vector<2x8x128xf32> to vector<8x128xf32>
    %31 = arith.addf %28, %30 : vector<8x128xf32>
    %c0_13 = arith.constant 0 : index
    %c0_14 = arith.constant 0 : index
    %32 = vector.load %arg4[%c0_13, %c0_14] : memref<8x128xf32, #tpu.memory_space<vmem>>, vector<8x128xf32>
    tpu.vector_store %arg4[%c0_13, %c0_14], %31 {strides = array<i32>} : memref<8x128xf32, #tpu.memory_space<vmem>>, vector<8x128xf32>,
    %c0_i32_15 = arith.constant 0 : i32
    %33 = arith.cmpi eq, %arg0, %c0_i32_15 : i32
    %34 = arith.extui %33 : i1 to i32
    %c0_i32_16 = arith.constant 0 : i32
    %35 = arith.cmpi ne, %34, %c0_i32_16 : i32
    scf.if %35 {
      %c0_17 = arith.constant 0 : index
      %c0_18 = arith.constant 0 : index
      %36 = vector.load %arg4[%c0_17, %c0_18] : memref<8x128xf32, #tpu.memory_space<vmem>>, vector<8x128xf32>
      %37 = vector.shape_cast %36 : vector<8x128xf32> to vector<1x8x128xf32>
      %cst_19 = arith.constant dense<0.000000e+00> : vector<1xf32>
      %38 = vector.multi_reduction <add>, %37, %cst_19 [1, 2] : vector<1x8x128xf32> to vector<1xf32>
      %39 = vector.shape_cast %38 : vector<1xf32> to vector<1x1x1xf32>
      %40 = vector.extract %39[0, 0, 0] : f32 from vector<1x1x1xf32>
      %cst_20 = arith.constant 2.44140625E-4 : f32
      %41 = arith.mulf %40, %cst_20 : f32
      %42 = vector.broadcast %41 : f32 to vector<8x128xf32>
      %c0_21 = arith.constant 0 : index
      %c0_22 = arith.constant 0 : index
      %43 = vector.load %arg3[%c0_21, %c0_22] : memref<8x128xf32, #tpu.memory_space<vmem>>, vector<8x128xf32>
      tpu.vector_store %arg3[%c0_21, %c0_22], %42 {strides = array<i32>} : memref<8x128xf32, #tpu.memory_space<vmem>>, vector<8x128xf32>,
    } else {
    }
    return
  }
  func.func @transform_0(%arg0: i32) -> (i32, i32) {
    %c0_i32 = arith.constant 0 : i32
    %c0_i32_0 = arith.constant 0 : i32
    return %arg0, %c0_i32 : i32, i32
  }
  func.func @transform_1(%arg0: i32) -> (i32, i32) {
    %c0_i32 = arith.constant 0 : i32
    %c0_i32_0 = arith.constant 0 : i32
    return %arg0, %c0_i32 : i32, i32
  }
  func.func @transform_2(%arg0: i32) -> (i32, i32) {
    %c0_i32 = arith.constant 0 : i32
    %c0_i32_0 = arith.constant 0 : i32
    %c0_i32_1 = arith.constant 0 : i32
    return %c0_i32, %c0_i32_0 : i32, i32
  }
}

</mosaic_0001>

<bundles_post_ra>
// kernel: tpu_custom_call.1
= control target key start
LH: loop header
LB: loop body
LE: loop exit
PB: predicated region body
PF: predicated region fallthrough
CT: control target
= control target key end

     0   :  { %7 = vsyncpa [#allocation4], 0  ;;  %s255_s0 = inlined_call_operand.hbm [shape: f32[16,128], index: 0, kind: input, shape index: {}]   ;;  %s256_s1 = inlined_call_operand.hbm [shape: f32[16,128], index: 1, kind: input, shape index: {}]   ;;  %s257_s2 = inlined_call_operand.hbm [shape: f32[8,128], index: 2, kind: output, shape index: {}]  }
   0x1   :  { %8 = vsyncpa [#allocation7], 0 }
   0x2   :  { %9 = vsyncpa [#allocation5], 0  ;;  %s14_s11 = sshll.u32 %s255_s0, 4  ;;  %s226_s12 = smov [#allocation3]   ;;  %s15_s11 = int_to_ptr.hbm [resolvable:$true] %s14_s11 }
   0x3   :  { %s16_s13 = sshll.u32 %s226_s12, 4  ;;  %s27_s16 = sshll.u32 %s256_s1, 4  ;;  %s17_s13 = int_to_ptr.vmem [resolvable:$true] %s16_s13  ;;  %s28_s16 = int_to_ptr.hbm [resolvable:$true] %s27_s16 }
   0x4   :  { %s227_s17 = smov 128   ;;  %s228_s18 = smov 8  }
   0x5   :  { %22 = dma.hbm_to_vmem [thread:$0]  %s15_s11, 256, %s17_s13, [#allocation4], %s227_s17, %s227_s17, %s228_s18  }
   0x6   :  { %s229_s19 = smov [#allocation6]  }
   0x7   :  { %s29_s20 = sshll.u32 %s229_s19, 4  ;;  %s30_s20 = int_to_ptr.vmem [resolvable:$true] %s29_s20 }
   0x8   :  { %35 = dma.hbm_to_vmem [thread:$0]  %s28_s16, 256, %s30_s20, [#allocation7], %s227_s17, %s227_s17, %s228_s18  }
   0x9   :  { %220 = dma.done.wait [#allocation4], 256  }
   0xa   :  { %221 = vsyncadd [#allocation4], 4294967040 }
   0xb   :  { %222 = dma.done.wait [#allocation7], 256  }
   0xc   :  { %223 = vsyncadd [#allocation7], 4294967040  ;;  %v49_v0 = vld [vmem:[#allocation3] sm:$0xff]  ;;  %v50_v1 = vld [vmem:[#allocation3 + $0x8] sm:$0xff]  ;;  %s230_s0 = smov [#allocation8]   ;;  %s118_s23 = sshll.u32 %s257_s2, 4  ;;  %s119_s23 = int_to_ptr.hbm [resolvable:$true] %s118_s23 }
   0xd   :  { %136 = vlog2.f32 %v49_v0  ;;  %v59_v2 = vsub.f32 1.0, %v49_v0  ;;  %v60_v3 = vsub.f32 1.0, %v50_v1  ;;  %v51_v5 = vld [vmem:[#allocation6] sm:$0xff]  ;;  %v52_v7 = vld [vmem:[#allocation6 + $0x8] sm:$0xff]  ;;  %s116_s1 = sshll.u32 %s230_s0, 4  ;;  %s117_s1 = int_to_ptr.vmem [resolvable:$true] %s116_s1 }
   0xe   :  { %138 = vlog2.f32 %v50_v1  ;;  %v69_v14 = vsub.f32 1.0, %v51_v5  ;;  %v70_v17 = vsub.f32 1.0, %v52_v7 }
   0xf   :  { %140 = vlog2.f32 %v59_v2 }
  0x10   :  { %142 = vlog2.f32 %v60_v3 }
  0x13   :  { %v137_v4 = vpop.eup %136 }
  0x14   :  { %v139_v6 = vpop.eup %138  ;;  %v54_v8 = vmul.f32 0.6931472, %v137_v4 }
  0x15   :  { %v141_v9 = vpop.eup %140  ;;  %v56_v10 = vmul.f32 0.6931472, %v139_v6 }
  0x16   :  { %v143_v11 = vpop.eup %142  ;;  %v57_v12 = vmax.f32 %v54_v8, -100.0  ;;  %v62_v13 = vmul.f32 0.6931472, %v141_v9 }
  0x17   :  { %v58_v15 = vmax.f32 %v56_v10, -100.0  ;;  %v64_v16 = vmul.f32 0.6931472, %v143_v11 }
  0x18   :  { %v65_v18 = vmax.f32 %v62_v13, -100.0  ;;  %v67_v19 = vmul.f32 %v57_v12, %v51_v5 }
  0x19   :  { %v66_v20 = vmax.f32 %v64_v16, -100.0  ;;  %v68_v21 = vmul.f32 %v58_v15, %v52_v7 }
  0x1a   :  { %v71_v22 = vmul.f32 %v69_v14, %v65_v18 }
  0x1b   :  { %v72_v23 = vmul.f32 %v70_v17, %v66_v20 }
  0x1c   :  { %v73_v24 = vadd.f32 %v71_v22, %v67_v19 }
  0x1d   :  { %v74_v25 = vadd.f32 %v72_v23, %v68_v21 }
  0x1e   :  { %v75_v26 = vsub.f32 0.0, %v73_v24 }
  0x1f   :  { %v76_v27 = vsub.f32 0.0, %v74_v25 }
  0x20   :  { %v77_v28 = vsub.f32 0.0, %v75_v26 }
  0x21   :  { %v78_v29 = vsub.f32 0.0, %v76_v27 }
  0x22   :  { %v79_v30 = vmul.f32 1.442695, %v77_v28 }
  0x23   :  { %v81_v31 = vmul.f32 1.442695, %v78_v29 }
  0x24   :  { %144 = vpow2.f32 %v79_v30 }
  0x25   :  { %146 = vpow2.f32 %v81_v31 }
  0x2a   :  { %v145_v32 = vpop.eup %144 }
  0x2b   :  { %v147_v33 = vpop.eup %146  ;;  %v83_v34 = vsub.f32 1.0, %v145_v32 }
  0x2c   :  { %v84_v35 = vsub.f32 1.0, %v147_v33 }
  0x2d   :  { %v85_v36 = vmul.f32 %v83_v34, %v83_v34 }
  0x2e   :  { %v86_v37 = vmul.f32 %v84_v35, %v84_v35 }
  0x2f   :  { %v87_v38 = vmul.f32 %v85_v36, %v85_v36 }
  0x30   :  { %v88_v39 = vmul.f32 %v86_v37, %v86_v37 }
  0x31   :  { %v89_v40 = vmul.f32 %v87_v38, %v75_v26 }
  0x32   :  { %v90_v41 = vmul.f32 %v88_v39, %v76_v27 }
  0x34   :  { %v92_v42 = vadd.f32 %v90_v41, %v89_v40 }
  0x36   :  { %99 = vadd.xlane.f32.xlu0 %v92_v42 }
  0xa9   :  { %v100_v43 = vpop.xlane.xlu0 %99 }
  0xaa   :  { %v101_v44 = vrot.slane %v100_v43, 4 }
  0xac   :  { %v102_v45 = vadd.f32 %v101_v44, %v100_v43 }
  0xae   :  { %v103_v46 = vrot.slane %v102_v45, 2 }
  0xb0   :  { %v104_v47 = vadd.f32 %v103_v46, %v102_v45 }
  0xb2   :  { %v105_v48 = vrot.slane %v104_v47, 1 }
  0xb4   :  { %v106_v49 = vadd.f32 %v105_v48, %v104_v47 }
  0xb6   :  { %129 = vpush %v106_v49 }
  0xe7   :  { %s130_s24 = spop %129 }
  0xe8   :  { %s108_s25 = smul.f32 0.00024414063, %s130_s24 }
  0xea   :  { %v109_v50 = vstv %s108_s25 }
  0xeb   :  { %110 = vst [vmem:[#allocation8] sm:$0xff] %v109_v50 }
  0xec   :  { %121 = dma.vmem_to_hbm [thread:$0]  %s117_s1, 128, %s119_s23, [#allocation5]  }
  0xed   :  { %224 = dma.done.wait [#allocation5], 128  }
  0xee   :  { %225 = vsyncadd [#allocation5], 4294967168 }
  0xef   :  { %126 = vsyncpa [#allocation4], 1 }
  0xf0   :  { %127 = vsyncpa [#allocation7], 1 }
  0xf1   :  { %128 = vsyncpa [#allocation5], 1 }

</bundles_post_ra>
